<compile_context>
chip_gen: v5e
topology: v5e:2x2
jax: 0.10.0
libtpu: 0.0.40
codegen_flags: <defaults>
</compile_context>

<pallas_src>
import functools

import numpy as np

import jax
import jax.numpy as jnp
from jax.experimental import pallas as pl
from jax.experimental.pallas import tpu as pltpu


# ----------------------------- fused Pallas kernel ---------------------------

def fused_encoder_kernel(x_ref, w_emb_ref, w_heads_ref, consts_ref, o_ref):
    f32 = jnp.float32
    bf16 = jnp.bfloat16
    n = x_ref.shape[0]                       # rows = batch * n_frames
    p = w_heads_ref.shape[1] // 2            # padded head width (>=128 lanes)

    def blk(k):                              # (n, D) pre-broadcast const block
        return consts_ref[k * n:(k + 1) * n, :]

    # --- image_encoder stand-in: dense 2x2 patch-embed + ReLU (bf16 MXU) -----
    feat = jnp.dot(x_ref[...].astype(bf16), w_emb_ref[...],
                   preferred_element_type=f32)
    feat = jnp.maximum(feat + blk(0), 0.0)                        # (n, D) f32

    # --- temporal_module stand-in: gated depthwise temporal conv (k=3) -------
    # x[n-1]/x[n+1] via XLU sublane rolls; sequence-boundary zeros are folded
    # into the pre-broadcast gate weights (blocks 2, 4, 5, 7).
    x_prev = pltpu.roll(feat, 1, axis=0)
    x_next = pltpu.roll(feat, n - 1, axis=0)
    a = x_prev * blk(2) + feat * blk(3) + x_next * blk(4) + blk(8)
    g = x_prev * blk(5) + feat * blk(6) + x_next * blk(7) + blk(9)
    x_t = jnp.tanh(a) * jax.nn.sigmoid(g)                         # (n, D) f32

    # --- spatial path + all four heads, folded at init into two matmuls ------
    #   lanes [0:p):  feat @ (W_spatial_fold @ [w_smu | w_ssig])   (conv chain folded)
    #   lanes [p:2p): x_t  @ [w_tmu | w_tsig]
    s_out = jnp.dot(feat.astype(bf16), w_heads_ref[:, 0:p],
                    preferred_element_type=f32)
    t_out = jnp.dot(x_t.astype(bf16), w_heads_ref[:, p:2 * p],
                    preferred_element_type=f32)
    o_ref[...] = s_out + t_out + blk(1)[:, 0:p]


# ----------------------------- forward wrapper -------------------------------

def entangled_st_encoder_forward(x, params, *, output_size):
    B, T, Cin, H, W = x.shape
    N = B * T
    x_flat = x.reshape(N, Cin * H * W)          # natural memory order, lane-dense
    p = params["w_heads"].shape[1] // 2
    assert 4 * output_size <= p
    assert params["consts"].shape[0] == 10 * N

    out = pl.pallas_call(
        fused_encoder_kernel,
        out_shape=jax.ShapeDtypeStruct((N, p), jnp.float32),
        in_specs=[pl.BlockSpec(memory_space=pltpu.MemorySpace.VMEM)] * 4,
        out_specs=pl.BlockSpec(memory_space=pltpu.MemorySpace.VMEM),
    )(x_flat, params["w_embed"], params["w_heads"], params["consts"])

    s = output_size
    o = out[:, :4 * s].reshape(B, T, 4 * s)
    return o[..., 0:s], o[..., s:2 * s], o[..., 2 * s:3 * s], o[..., 3 * s:4 * s]


# --------------------- init: fold module weights into kernel operands --------

def _patch_embed_to_dense(w_patch, bias, cin, h, w, c):
    """(2,2,Cin,C) 2x2 patch weights -> dense (Cin*H*W, C*Ho*Wo) matrix acting on a
    (Cin,H,W)-flattened image; output flattened (C, Ho, Wo).  Flat bias (1, D)."""
    ho, wo = h // 2, w // 2
    dense = np.zeros((cin, h, w, c, ho, wo), np.float32)
    for dy in range(2):
        for dx in range(2):
            for py in range(ho):
                for px in range(wo):
                    dense[:, 2 * py + dy, 2 * px + dx, :, py, px] = w_patch[dy, dx]
    return dense.reshape(cin * h * w, c * ho * wo), np.repeat(bias, ho * wo)[None, :]


def _conv3x3_to_dense(w_taps, bias, c, ho, wo):
    """(3,3,Cin,Cout) 'same'-padded conv taps -> dense (D, D) matrix acting on a
    (C,Ho,Wo)-flattened feature map.  Flat per-channel bias (1, D)."""
    d = c * ho * wo
    dense = np.zeros((c, ho, wo, c, ho, wo), np.float32)
    for ky in range(3):
        for kx in range(3):
            for oy in range(ho):
                for ox in range(wo):
                    iy, ix = oy + ky - 1, ox + kx - 1
                    if 0 <= iy < ho and 0 <= ix < wo:
                        dense[:, iy, ix, :, oy, ox] = w_taps[ky, kx]
    return dense.reshape(d, d), np.repeat(bias, ho * wo)[None, :]


def init_params(key, *, batch, n_frames, cin, h, w, image_out_size,
                image_out_channel, output_size):
    ho, wo = image_out_size
    assert h == 2 * ho and w == 2 * wo, "2x2 patch-embed stand-in needs H,W = 2*out"
    c = image_out_channel
    d = ho * wo * c
    out = output_size
    n = batch * n_frames
    p = max(128, -(-4 * out // 128) * 128)        # padded head width (>=128 lanes)
    assert p <= d, "head padding layout assumes 4*output_size <= image latent size"

    keys = jax.random.split(key, 20)

    def nrm(k, shape, scale):
        return np.asarray(jax.random.normal(k, shape, dtype=jnp.float32)) * np.float32(scale)

    # ---- module-style weights (same distributions as the original stand-ins) ----
    w_enc = nrm(keys[0], (2, 2, cin, c), (4 * cin) ** -0.5)   # 2x2 patch embed
    b_enc = nrm(keys[1], (c,), 0.01)
    wa_t = nrm(keys[2], (3, d), 3 ** -0.5)                    # temporal gate (k=3)
    wg_t = nrm(keys[3], (3, d), 3 ** -0.5)
    ba_t = nrm(keys[4], (d,), 0.01)
    bg_t = nrm(keys[5], (d,), 0.01)
    w_c = [nrm(keys[6 + 2 * i], (3, 3, c, c), (9 * c) ** -0.5) for i in range(3)]
    b_c = [nrm(keys[7 + 2 * i], (c,), 0.01) for i in range(3)]
    w_smu = nrm(keys[12], (d, out), d ** -0.5); b_smu = nrm(keys[13], (out,), 0.01)
    w_ssig = nrm(keys[14], (d, out), d ** -0.5); b_ssig = nrm(keys[15], (out,), 0.01)
    w_tmu = nrm(keys[16], (d, out), d ** -0.5); b_tmu = nrm(keys[17], (out,), 0.01)
    w_tsig = nrm(keys[18], (d, out), d ** -0.5); b_tsig = nrm(keys[19], (out,), 0.01)

    # ---- one-off host-side f32 folding into lane-dense kernel operands ----------
    w_embed, b_embed = _patch_embed_to_dense(w_enc, b_enc, cin, h, w, c)
    wc1, bc1 = _conv3x3_to_dense(w_c[0], b_c[0], c, ho, wo)
    wc2, bc2 = _conv3x3_to_dense(w_c[1], b_c[1], c, ho, wo)
    wc3, bc3 = _conv3x3_to_dense(w_c[2], b_c[2], c, ho, wo)

    # spatial chain is strictly linear -> fold conv1(+residual), conv2, conv3 ...
    w_s = (wc1 + np.eye(d, dtype=np.float32)) @ wc2 @ wc3                 # (d, d)
    b_s = bc1 @ wc2 @ wc3 + bc2 @ wc3 + bc3                               # (1, d)

    # ... and fold the spatial heads through it; pad all heads to p lanes.
    w_sh = np.zeros((d, p), np.float32)
    w_sh[:, 0 * out:1 * out] = w_s @ w_smu
    w_sh[:, 1 * out:2 * out] = w_s @ w_ssig
    w_th = np.zeros((d, p), np.float32)
    w_th[:, 2 * out:3 * out] = w_tmu
    w_th[:, 3 * out:4 * out] = w_tsig
    w_heads = np.concatenate([w_sh, w_th], axis=1)                        # (d, 2p)

    b_all = np.zeros((p,), np.float32)
    b_all[0 * out:1 * out] = (b_s @ w_smu)[0] + b_smu
    b_all[1 * out:2 * out] = (b_s @ w_ssig)[0] + b_ssig
    b_all[2 * out:3 * out] = b_tmu
    b_all[3 * out:4 * out] = b_tsig

    # sequence-boundary masks of the k=3 temporal conv, folded into gate weights
    idx = np.arange(n)
    mask_prev = (idx % n_frames != 0).astype(np.float32)[:, None]             # no x[n-1] at seq start
    mask_next = (idx % n_frames != n_frames - 1).astype(np.float32)[:, None]  # no x[n+1] at seq end

    ones = np.ones((n, 1), np.float32)
    b_all_row = np.zeros((1, d), np.float32)
    b_all_row[0, :p] = b_all
    consts = np.concatenate([
        ones * b_embed,                # 0: embed bias
        ones * b_all_row,              # 1: folded head bias (lanes [0:p))
        mask_prev * wa_t[0:1],         # 2: wa0 with seq-start zeros folded in
        ones * wa_t[1:2],              # 3: wa1
        mask_next * wa_t[2:3],         # 4: wa2 with seq-end zeros folded in
        mask_prev * wg_t[0:1],         # 5: wg0
        ones * wg_t[1:2],              # 6: wg1
        mask_next * wg_t[2:3],         # 7: wg2
        ones * ba_t[None, :],          # 8: ba
        ones * bg_t[None, :],          # 9: bg
    ], axis=0)                                                            # (10n, d)

    return {
        "w_embed": jnp.asarray(w_embed, jnp.bfloat16),
        "w_heads": jnp.asarray(w_heads, jnp.bfloat16),
        "consts": jnp.asarray(consts, jnp.float32),
        # unfolded f32 pieces, used only by the ground-truth reference:
        "ref": {
            "w_embed": jnp.asarray(w_embed), "b_embed": jnp.asarray(b_embed),
            "wc1": jnp.asarray(wc1), "bc1": jnp.asarray(bc1),
            "wc2": jnp.asarray(wc2), "bc2": jnp.asarray(bc2),
            "wc3": jnp.asarray(wc3), "bc3": jnp.asarray(bc3),
            "wa": jnp.asarray(wa_t), "wg": jnp.asarray(wg_t),
            "ba": jnp.asarray(ba_t), "bg": jnp.asarray(bg_t),
            "w_smu": jnp.asarray(w_smu), "b_smu": jnp.asarray(b_smu),
            "w_ssig": jnp.asarray(w_ssig), "b_ssig": jnp.asarray(b_ssig),
            "w_tmu": jnp.asarray(w_tmu), "b_tmu": jnp.asarray(b_tmu),
            "w_tsig": jnp.asarray(w_tsig), "b_tsig": jnp.asarray(b_tsig),
            "mask_prev": jnp.asarray(mask_prev), "mask_next": jnp.asarray(mask_next),
        },
    }


# ----------------------------- pure-JAX references ---------------------------

def _reference_forward_mirrored(x, params, *, output_size):
    """Mirror of the fused kernel math (folded weights, bf16 MXU operands)."""
    f32, bf16 = jnp.float32, jnp.bfloat16
    B, T = x.shape[0], x.shape[1]
    n = B * T
    xf = x.reshape(n, -1)
    consts = params["consts"]
    blk = lambda k: consts[k * n:(k + 1) * n, :]
    feat = jnp.dot(xf.astype(bf16), params["w_embed"], preferred_element_type=f32)
    feat = jnp.maximum(feat + blk(0), 0.0)
    x_prev = jnp.roll(feat, 1, axis=0)
    x_next = jnp.roll(feat, -1, axis=0)
    a = x_prev * blk(2) + feat * blk(3) + x_next * blk(4) + blk(8)
    g = x_prev * blk(5) + feat * blk(6) + x_next * blk(7) + blk(9)
    x_t = jnp.tanh(a) * jax.nn.sigmoid(g)
    p = params["w_heads"].shape[1] // 2
    o = (jnp.dot(feat.astype(bf16), params["w_heads"][:, :p], preferred_element_type=f32)
         + jnp.dot(x_t.astype(bf16), params["w_heads"][:, p:], preferred_element_type=f32)
         + blk(1)[:, :p])
    s = output_size
    o = o[:, :4 * s].reshape(B, T, 4 * s)
    return o[..., 0:s], o[..., s:2 * s], o[..., 2 * s:3 * s], o[..., 3 * s:4 * s]


def _reference_forward_unfolded(x, ref, *, output_size):
    """Ground truth: unfolded f32 math mirroring the original module structure."""
    B, T = x.shape[0], x.shape[1]
    xf = x.reshape(B * T, -1)
    feat = jnp.maximum(xf @ ref["w_embed"] + ref["b_embed"], 0.0)
    x_prev = jnp.roll(feat, 1, axis=0) * ref["mask_prev"]
    x_next = jnp.roll(feat, -1, axis=0) * ref["mask_next"]
    wa, wg = ref["wa"], ref["wg"]
    a = x_prev * wa[0] + feat * wa[1] + x_next * wa[2] + ref["ba"]
    g = x_prev * wg[0] + feat * wg[1] + x_next * wg[2] + ref["bg"]
    x_t = jnp.tanh(a) * jax.nn.sigmoid(g)
    x1 = feat @ ref["wc1"] + ref["bc1"] + feat
    x2 = x1 @ ref["wc2"] + ref["bc2"]
    x_s = x2 @ ref["wc3"] + ref["bc3"]
    s = output_size
    s_mu = (x_s @ ref["w_smu"] + ref["b_smu"]).reshape(B, T, s)
    s_sig = (x_s @ ref["w_ssig"] + ref["b_ssig"]).reshape(B, T, s)
    t_mu = (x_t @ ref["w_tmu"] + ref["b_tmu"]).reshape(B, T, s)
    t_sig = (x_t @ ref["w_tsig"] + ref["b_tsig"]).reshape(B, T, s)
    return s_mu, s_sig, t_mu, t_sig


# --------------------------------- main ---------------------------------------

if __name__ == "__main__":
    B, T, Cin, H, W = 2, 4, 2, 16, 16
    image_out_size = (8, 8)
    image_out_channel = 4
    output_size = 16

    key = jax.random.PRNGKey(0)
    kx, kp = jax.random.split(key)
    x = jax.random.normal(kx, (B, T, Cin, H, W), dtype=jnp.float32)
    params = init_params(kp, batch=B, n_frames=T, cin=Cin, h=H, w=W,
                         image_out_size=image_out_size,
                         image_out_channel=image_out_channel,
                         output_size=output_size)
    ref_weights = params.pop("ref")

    fwd = jax.jit(functools.partial(entangled_st_encoder_forward,
                                    output_size=output_size))
    outs = jax.block_until_ready(fwd(x, params))

    expected = (B, T, output_size)
    assert all(o.shape == expected for o in outs), [o.shape for o in outs]
    assert all(o.dtype == jnp.float32 for o in outs)

    # Tight check against a pure-JAX mirror of the exact kernel math.
    refs_m = _reference_forward_mirrored(x, params, output_size=output_size)
    for o, r in zip(outs, refs_m):
        err = float(jnp.max(jnp.abs(o - r)))
        assert jnp.allclose(o, r, rtol=1e-3, atol=1e-3), err

    # Loose check against the unfolded f32 module math (validates the init-time
    # folding of the conv chain / heads and the bf16 weight quantization).
    refs_u = _reference_forward_unfolded(x, ref_weights, output_size=output_size)
    for o, r in zip(outs, refs_u):
        err = float(jnp.max(jnp.abs(o - r)))
        assert jnp.allclose(o, r, rtol=5e-2, atol=5e-2), err

    print("KERNEL_OK")
</pallas_src>

<mosaic_0001>
module attributes {stable_mosaic.version = 11 : i64} {
  func.func @fused_encoder_kernel(%arg0: memref<8x512xf32, #tpu.memory_space<vmem>>, %arg1: memref<512x256xbf16, #tpu.memory_space<vmem>>, %arg2: memref<256x256xbf16, #tpu.memory_space<vmem>>, %arg3: memref<80x256xf32, #tpu.memory_space<vmem>>, %arg4: memref<8x128xf32, #tpu.memory_space<vmem>>) attributes {dimension_semantics = [], scalar_prefetch = 0 : i64, scratch_operands = 0 : i64, tpu.core_type = #tpu.core_type<tc>} {
    %c0 = arith.constant 0 : index
    %c0_0 = arith.constant 0 : index
    %0 = vector.load %arg0[%c0, %c0_0] : memref<8x512xf32, #tpu.memory_space<vmem>>, vector<8x512xf32>
    %1 = arith.truncf %0 : vector<8x512xf32> to vector<8x512xbf16>
    %c0_1 = arith.constant 0 : index
    %c0_2 = arith.constant 0 : index
    %2 = vector.load %arg1[%c0_1, %c0_2] : memref<512x256xbf16, #tpu.memory_space<vmem>>, vector<512x256xbf16>
    %cst = arith.constant dense<0.000000e+00> : vector<8x256xf32>
    %3 = tpu.matmul %1, %2, %cst {dimension_numbers = #tpu.dot_dimension_numbers<[1], [0], [0], [1], [0, 0, 1, 1], [], []>} : vector<8x512xbf16>, vector<512x256xbf16>, vector<8x256xf32> -> vector<8x256xf32>
    %c0_3 = arith.constant 0 : index
    %c0_4 = arith.constant 0 : index
    %4 = vector.load %arg3[%c0_3, %c0_4] : memref<80x256xf32, #tpu.memory_space<vmem>>, vector<8x256xf32>
    %5 = arith.addf %3, %4 : vector<8x256xf32>
    %cst_5 = arith.constant 0.000000e+00 : f32
    %6 = vector.broadcast %cst_5 : f32 to vector<8x256xf32>
    %7 = arith.maximumf %5, %6 : vector<8x256xf32>
    %c1_i32 = arith.constant 1 : i32
    %8 = tpu.dynamic_rotate %7 by %c1_i32 dim 0 : vector<8x256xf32>, i32 -> vector<8x256xf32>
    %c7_i32 = arith.constant 7 : i32
    %9 = tpu.dynamic_rotate %7 by %c7_i32 dim 0 : vector<8x256xf32>, i32 -> vector<8x256xf32>
    %c16 = arith.constant 16 : index
    %c0_6 = arith.constant 0 : index
    %10 = vector.load %arg3[%c16, %c0_6] : memref<80x256xf32, #tpu.memory_space<vmem>>, vector<8x256xf32>
    %11 = arith.mulf %8, %10 : vector<8x256xf32>
    %c24 = arith.constant 24 : index
    %c0_7 = arith.constant 0 : index
    %12 = vector.load %arg3[%c24, %c0_7] : memref<80x256xf32, #tpu.memory_space<vmem>>, vector<8x256xf32>
    %13 = arith.mulf %7, %12 : vector<8x256xf32>
    %14 = arith.addf %11, %13 : vector<8x256xf32>
    %c32 = arith.constant 32 : index
    %c0_8 = arith.constant 0 : index
    %15 = vector.load %arg3[%c32, %c0_8] : memref<80x256xf32, #tpu.memory_space<vmem>>, vector<8x256xf32>
    %16 = arith.mulf %9, %15 : vector<8x256xf32>
    %17 = arith.addf %14, %16 : vector<8x256xf32>
    %c64 = arith.constant 64 : index
    %c0_9 = arith.constant 0 : index
    %18 = vector.load %arg3[%c64, %c0_9] : memref<80x256xf32, #tpu.memory_space<vmem>>, vector<8x256xf32>
    %19 = arith.addf %17, %18 : vector<8x256xf32>
    %c40 = arith.constant 40 : index
    %c0_10 = arith.constant 0 : index
    %20 = vector.load %arg3[%c40, %c0_10] : memref<80x256xf32, #tpu.memory_space<vmem>>, vector<8x256xf32>
    %21 = arith.mulf %8, %20 : vector<8x256xf32>
    %c48 = arith.constant 48 : index
    %c0_11 = arith.constant 0 : index
    %22 = vector.load %arg3[%c48, %c0_11] : memref<80x256xf32, #tpu.memory_space<vmem>>, vector<8x256xf32>
    %23 = arith.mulf %7, %22 : vector<8x256xf32>
    %24 = arith.addf %21, %23 : vector<8x256xf32>
    %c56 = arith.constant 56 : index
    %c0_12 = arith.constant 0 : index
    %25 = vector.load %arg3[%c56, %c0_12] : memref<80x256xf32, #tpu.memory_space<vmem>>, vector<8x256xf32>
    %26 = arith.mulf %9, %25 : vector<8x256xf32>
    %27 = arith.addf %24, %26 : vector<8x256xf32>
    %c72 = arith.constant 72 : index
    %c0_13 = arith.constant 0 : index
    %28 = vector.load %arg3[%c72, %c0_13] : memref<80x256xf32, #tpu.memory_space<vmem>>, vector<8x256xf32>
    %29 = arith.addf %27, %28 : vector<8x256xf32>
    %30 = math.tanh %19 : vector<8x256xf32>
    %31 = arith.negf %29 : vector<8x256xf32>
    %32 = math.exp %31 : vector<8x256xf32>
    %cst_14 = arith.constant 1.000000e+00 : f32
    %33 = vector.broadcast %cst_14 : f32 to vector<8x256xf32>
    %34 = arith.addf %33, %32 : vector<8x256xf32>
    %35 = arith.divf %33, %34 : vector<8x256xf32>
    %36 = arith.mulf %30, %35 : vector<8x256xf32>
    %37 = arith.truncf %7 : vector<8x256xf32> to vector<8x256xbf16>
    %c0_15 = arith.constant 0 : index
    %c0_16 = arith.constant 0 : index
    %38 = vector.load %arg2[%c0_15, %c0_16] : memref<256x256xbf16, #tpu.memory_space<vmem>>, vector<256x128xbf16>
    %cst_17 = arith.constant dense<0.000000e+00> : vector<8x128xf32>
    %39 = tpu.matmul %37, %38, %cst_17 {dimension_numbers = #tpu.dot_dimension_numbers<[1], [0], [0], [1], [0, 0, 1, 1], [], []>} : vector<8x256xbf16>, vector<256x128xbf16>, vector<8x128xf32> -> vector<8x128xf32>
    %40 = arith.truncf %36 : vector<8x256xf32> to vector<8x256xbf16>
    %c0_18 = arith.constant 0 : index
    %c128 = arith.constant 128 : index
    %41 = vector.load %arg2[%c0_18, %c128] : memref<256x256xbf16, #tpu.memory_space<vmem>>, vector<256x128xbf16>
    %cst_19 = arith.constant dense<0.000000e+00> : vector<8x128xf32>
    %42 = tpu.matmul %40, %41, %cst_19 {dimension_numbers = #tpu.dot_dimension_numbers<[1], [0], [0], [1], [0, 0, 1, 1], [], []>} : vector<8x256xbf16>, vector<256x128xbf16>, vector<8x128xf32> -> vector<8x128xf32>
    %43 = arith.addf %39, %42 : vector<8x128xf32>
    %c8 = arith.constant 8 : index
    %c0_20 = arith.constant 0 : index
    %44 = vector.load %arg3[%c8, %c0_20] : memref<80x256xf32, #tpu.memory_space<vmem>>, vector<8x256xf32>
    %45 = vector.extract_strided_slice %44 {offsets = [0, 0], sizes = [8, 128], strides = [1, 1]} : vector<8x256xf32> to vector<8x128xf32>
    %46 = arith.addf %43, %45 : vector<8x128xf32>
    %c0_21 = arith.constant 0 : index
    %c0_22 = arith.constant 0 : index
    %47 = vector.load %arg4[%c0_21, %c0_22] : memref<8x128xf32, #tpu.memory_space<vmem>>, vector<8x128xf32>
    tpu.vector_store %arg4[%c0_21, %c0_22], %46 {strides = array<i32>} : memref<8x128xf32, #tpu.memory_space<vmem>>, vector<8x128xf32>,
    return
  }
}

</mosaic_0001>

<bundles_post_ra>
// kernel: entangled_st_encoder_forward.1
= control target key start
LH: loop header
LB: loop body
LE: loop exit
PB: predicated region body
PF: predicated region fallthrough
CT: control target
= control target key end

     0   :  { %9 = vsyncpa [#allocation3], 0  ;;  %s1775_s0 = inlined_call_operand.vmem [shape: f32[8,512], index: 0, kind: input, shape index: {}]   ;;  %s1776_s1 = inlined_call_operand.hbm [shape: bf16[512,256], index: 1, kind: input, shape index: {}]   ;;  %s1777_s2 = inlined_call_operand.vmem [shape: bf16[256,256], index: 2, kind: input, shape index: {}]   ;;  %s1778_s3 = inlined_call_operand.hbm [shape: f32[80,256], index: 3, kind: input, shape index: {}]   ;;  %s1779_s4 = inlined_call_operand.vmem [shape: f32[8,128], index: 4, kind: output, shape index: {}]  }
   0x1   :  { %s17_s17 = sshll.u32 %s1776_s1, 4  ;;  %s18_s17 = int_to_ptr.hbm [resolvable:$true] %s17_s17 }
   0x2   :  { %10 = vsyncpa [#allocation5], 0  ;;  %s1508_s18 = smov [#allocation2]   ;;  %s32_s22 = sshll.u32 %s1778_s3, 4  ;;  %s33_s22 = int_to_ptr.hbm [resolvable:$true] %s32_s22 }
   0x3   :  { %s19_s19 = sshll.u32 %s1508_s18, 4  ;;  %s1509_s23 = smov 128   ;;  %s20_s19 = int_to_ptr.vmem [resolvable:$true] %s19_s19 }
   0x4   :  { %s1510_s24 = smov 8   ;;  %s1511_s25 = smov [#allocation4]  }
   0x5   :  { %25 = dma.hbm_to_vmem [thread:$0]  %s18_s17, 8192, %s20_s19, [#allocation3], %s1509_s23, %s1509_s23, %s1510_s24  }
   0x6   :  { %s34_s26 = sshll.u32 %s1511_s25, 4  ;;  %s1512_s27 = smov 256   ;;  %s35_s26 = int_to_ptr.vmem [resolvable:$true] %s34_s26 }
   0x7   :  { %s1513_s28 = smov 16  }
   0x8   :  { %40 = dma.hbm_to_vmem [thread:$0]  %s33_s22, 2560, %s35_s26, [#allocation5], %s1512_s27, %s1512_s27, %s1513_s28  }
   0x9   :  { %1504 = dma.done.wait [#allocation3], 8192  }
   0xa   :  { %1505 = vsyncadd [#allocation3], 4294959104 }
   0xb   :  { %1506 = dma.done.wait [#allocation5], 2560  }
   0xc   :  { %1507 = vsyncadd [#allocation5], 4294964736  ;;  %v1014_v0 = vld [vmem:[#allocation2 + $0x70] sm:$0xf]  ;;  %v1357_v1 = vld [vmem:[#allocation2 + $0x74] sm:$0xf0] }
   0xd   :  { %v1078_v2 = vld [vmem:[#allocation2 + $0xf0] sm:$0xf]  ;;  %v1015_v3 = vor.u32 %v1357_v1, %v1014_v0  ;;  %v1373_v4 = vld [vmem:[#allocation2 + $0xf4] sm:$0xf0]  ;;  %v1006_v11 = vld [vmem:[#allocation2 + $0x60] sm:$0xf] }
   0xe   :  { %v1142_v5 = vld [vmem:[#allocation2 + $0x170] sm:$0xf]  ;;  %v1389_v6 = vld [vmem:[#allocation2 + $0x174] sm:$0xf0]  ;;  %v1079_v7 = vor.u32 %v1373_v4, %v1078_v2  ;;  %v1355_v13 = vld [vmem:[#allocation2 + $0x64] sm:$0xf0] }
   0xf   :  { %v1143_v8 = vor.u32 %v1389_v6, %v1142_v5  ;;  %v1206_v9 = vld [vmem:[#allocation2 + $0x1f0] sm:$0xf]  ;;  %v1405_v10 = vld [vmem:[#allocation2 + $0x1f4] sm:$0xf0]  ;;  %443 = vmatpush.bf16.msra.mxu0 %v1015_v3  ;;  %v1070_v14 = vld [vmem:[#allocation2 + $0xe0] sm:$0xf]  ;;  %v1007_v16 = vor.u32 %v1355_v13, %v1006_v11 }
  0x10   :  { %v1207_v12 = vor.u32 %v1405_v10, %v1206_v9  ;;  %v1371_v15 = vld [vmem:[#allocation2 + $0xe4] sm:$0xf0]  ;;  %456 = vmatpush.bf16.msra.mxu1 %v1079_v7  ;;  %v1134_v18 = vld [vmem:[#allocation2 + $0x160] sm:$0xf]  ;;  %v998_v23 = vld [vmem:[#allocation2 + $0x50] sm:$0xf] }
  0x11   :  { %469 = vmatpush.bf16.msra.mxu2 %v1143_v8  ;;  %v1071_v17 = vor.u32 %v1371_v15, %v1070_v14  ;;  %v1387_v19 = vld [vmem:[#allocation2 + $0x164] sm:$0xf0]  ;;  %v1198_v20 = vld [vmem:[#allocation2 + $0x1e0] sm:$0xf]  ;;  %v1353_v24 = vld [vmem:[#allocation2 + $0x54] sm:$0xf0] }
  0x12   :  { %482 = vmatpush.bf16.msra.mxu3 %v1207_v12  ;;  %v1135_v21 = vor.u32 %v1387_v19, %v1134_v18  ;;  %v1403_v22 = vld [vmem:[#allocation2 + $0x1e4] sm:$0xf0]  ;;  %v1062_v26 = vld [vmem:[#allocation2 + $0xd0] sm:$0xf]  ;;  %v1369_v27 = vld [vmem:[#allocation2 + $0xd4] sm:$0xf0]  ;;  %v999_v29 = vor.u32 %v1353_v24, %v998_v23 }
  0x13   :  { %v1199_v25 = vor.u32 %v1403_v22, %v1198_v20  ;;  %v1126_v28 = vld [vmem:[#allocation2 + $0x150] sm:$0xf]  ;;  %444 = vmatpush.bf16.msra.mxu0 %v1007_v16  ;;  %v1385_v30 = vld [vmem:[#allocation2 + $0x154] sm:$0xf0]  ;;  %v1063_v33 = vor.u32 %v1369_v27, %v1062_v26  ;;  %v990_v35 = vld [vmem:[#allocation2 + $0x40] sm:$0xf] }
  0x14   :  { %v1190_v31 = vld [vmem:[#allocation2 + $0x1d0] sm:$0xf]  ;;  %v1401_v32 = vld [vmem:[#allocation2 + $0x1d4] sm:$0xf0]  ;;  %457 = vmatpush.bf16.msra.mxu1 %v1071_v17  ;;  %v1127_v34 = vor.u32 %v1385_v30, %v1126_v28  ;;  %v1351_v36 = vld [vmem:[#allocation2 + $0x44] sm:$0xf0] }
  0x15   :  { %470 = vmatpush.bf16.msra.mxu2 %v1135_v21  ;;  %v1054_v37 = vld [vmem:[#allocation2 + $0xc0] sm:$0xf]  ;;  %v1191_v38 = vor.u32 %v1401_v32, %v1190_v31  ;;  %v1367_v39 = vld [vmem:[#allocation2 + $0xc4] sm:$0xf0]  ;;  %v991_v44 = vor.u32 %v1351_v36, %v990_v35  ;;  %v982_v47 = vld [vmem:[#allocation2 + $0x30] sm:$0xf] }
  0x16   :  { %483 = vmatpush.bf16.msra.mxu3 %v1199_v25  ;;  %v1118_v40 = vld [vmem:[#allocation2 + $0x140] sm:$0xf]  ;;  %v1383_v41 = vld [vmem:[#allocation2 + $0x144] sm:$0xf0]  ;;  %v1055_v45 = vor.u32 %v1367_v39, %v1054_v37  ;;  %v1349_v48 = vld [vmem:[#allocation2 + $0x34] sm:$0xf0] }
  0x17   :  { %v1182_v42 = vld [vmem:[#allocation2 + $0x1c0] sm:$0xf]  ;;  %v1399_v43 = vld [vmem:[#allocation2 + $0x1c4] sm:$0xf0]  ;;  %445 = vmatpush.bf16.msra.mxu0 %v999_v29  ;;  %v1119_v46 = vor.u32 %v1383_v41, %v1118_v40  ;;  %v1046_v49 = vld [vmem:[#allocation2 + $0xb0] sm:$0xf]  ;;  %v983_v56 = vor.u32 %v1349_v48, %v982_v47 }
  0x18   :  { %458 = vmatpush.bf16.msra.mxu1 %v1063_v33  ;;  %v1183_v50 = vor.u32 %v1399_v43, %v1182_v42  ;;  %v1365_v51 = vld [vmem:[#allocation2 + $0xb4] sm:$0xf0]  ;;  %v1110_v52 = vld [vmem:[#allocation2 + $0x130] sm:$0xf]  ;;  %v974_v59 = vld [vmem:[#allocation2 + $0x20] sm:$0xf] }
  0x19   :  { %471 = vmatpush.bf16.msra.mxu2 %v1127_v34  ;;  %v1381_v53 = vld [vmem:[#allocation2 + $0x134] sm:$0xf0]  ;;  %v1174_v54 = vld [vmem:[#allocation2 + $0x1b0] sm:$0xf]  ;;  %v1047_v57 = vor.u32 %v1365_v51, %v1046_v49  ;;  %v1347_v60 = vld [vmem:[#allocation2 + $0x24] sm:$0xf0] }
  0x1a   :  { %484 = vmatpush.bf16.msra.mxu3 %v1191_v38  ;;  %v1397_v55 = vld [vmem:[#allocation2 + $0x1b4] sm:$0xf0]  ;;  %v1111_v58 = vor.u32 %v1381_v53, %v1110_v52  ;;  %v1038_v61 = vld [vmem:[#allocation2 + $0xa0] sm:$0xf]  ;;  %v1363_v63 = vld [vmem:[#allocation2 + $0xa4] sm:$0xf0]  ;;  %v975_v4 = vor.u32 %v1347_v60, %v974_v59 }
  0x1b   :  { %446 = vmatpush.bf16.msra.mxu0 %v991_v44  ;;  %v1175_v62 = vor.u32 %v1397_v55, %v1174_v54  ;;  %v1102_v0 = vld [vmem:[#allocation2 + $0x120] sm:$0xf]  ;;  %v1379_v1 = vld [vmem:[#allocation2 + $0x124] sm:$0xf0]  ;;  %v1039_v5 = vor.u32 %v1363_v63, %v1038_v61  ;;  %v966_v7 = vld [vmem:[#allocation2 + $0x10] sm:$0xf] }
  0x1c   :  { %459 = vmatpush.bf16.msra.mxu1 %v1055_v45  ;;  %v1166_v2 = vld [vmem:[#allocation2 + $0x1a0] sm:$0xf]  ;;  %v1395_v3 = vld [vmem:[#allocation2 + $0x1a4] sm:$0xf0]  ;;  %v1103_v6 = vor.u32 %v1379_v1, %v1102_v0  ;;  %v1345_v8 = vld [vmem:[#allocation2 + $0x14] sm:$0xf0] }
  0x1d   :  { %472 = vmatpush.bf16.msra.mxu2 %v1119_v46  ;;  %v1030_v9 = vld [vmem:[#allocation2 + $0x90] sm:$0xf]  ;;  %v1167_v10 = vor.u32 %v1395_v3, %v1166_v2  ;;  %v1361_v11 = vld [vmem:[#allocation2 + $0x94] sm:$0xf0]  ;;  %v967_v16 = vor.u32 %v1345_v8, %v966_v7  ;;  %v958_v17 = vld [vmem:[#allocation2] sm:$0xf] }
  0x1e   :  { %485 = vmatpush.bf16.msra.mxu3 %v1183_v50  ;;  %v1094_v12 = vld [vmem:[#allocation2 + $0x110] sm:$0xf]  ;;  %v1377_v13 = vld [vmem:[#allocation2 + $0x114] sm:$0xf0]  ;;  %v1343_v18 = vld [vmem:[#allocation2 + $0x4] sm:$0xf0]  ;;  %v1031_v19 = vor.u32 %v1361_v11, %v1030_v9 }
  0x1f   :  { %447 = vmatpush.bf16.msra.mxu0 %v983_v56  ;;  %v1158_v14 = vld [vmem:[#allocation2 + $0x190] sm:$0xf]  ;;  %v1393_v15 = vld [vmem:[#allocation2 + $0x194] sm:$0xf0]  ;;  %v1095_v20 = vor.u32 %v1377_v13, %v1094_v12  ;;  %v1022_v21 = vld [vmem:[#allocation2 + $0x80] sm:$0xf]  ;;  %v959_v31 = vor.u32 %v1343_v18, %v958_v17 }
  0x20   :  { %460 = vmatpush.bf16.msra.mxu1 %v1047_v57  ;;  %v1359_v22 = vld [vmem:[#allocation2 + $0x84] sm:$0xf0]  ;;  %v1086_v23 = vld [vmem:[#allocation2 + $0x100] sm:$0xf]  ;;  %v1159_v24 = vor.u32 %v1393_v15, %v1158_v14  ;;  %v1356_v28 = vld [vmem:[#allocation2 + $0x74] sm:$0xf] }
  0x21   :  { %473 = vmatpush.bf16.msra.mxu2 %v1111_v58  ;;  %v1375_v25 = vld [vmem:[#allocation2 + $0x104] sm:$0xf0]  ;;  %v1150_v26 = vld [vmem:[#allocation2 + $0x180] sm:$0xf]  ;;  %v1016_v29 = vld [vmem:[#allocation2 + $0x78] sm:$0xf0]  ;;  %v1023_v35 = vor.u32 %v1359_v22, %v1022_v21 }
  0x22   :  { %486 = vmatpush.bf16.msra.mxu3 %v1175_v62  ;;  %v1391_v27 = vld [vmem:[#allocation2 + $0x184] sm:$0xf0]  ;;  %v1372_v30 = vld [vmem:[#allocation2 + $0xf4] sm:$0xf]  ;;  %v1080_v32 = vld [vmem:[#allocation2 + $0xf8] sm:$0xf0]  ;;  %v1087_v36 = vor.u32 %v1375_v25, %v1086_v23  ;;  %v1019_v41 = vor.u32 %v1356_v28, %v1016_v29 }
  0x23   :  { %448 = vmatpush.bf16.msra.mxu0 %v975_v4  ;;  %v1388_v33 = vld [vmem:[#allocation2 + $0x174] sm:$0xf]  ;;  %v1144_v34 = vld [vmem:[#allocation2 + $0x178] sm:$0xf0]  ;;  %v1151_v40 = vor.u32 %v1391_v27, %v1150_v26  ;;  %v49_v42 = vld [vmem:[%s1775_s0] sm:$0xff]  ;;  %v1083_v45 = vor.u32 %v1372_v30, %v1080_v32 }
  0x24   :  { %461 = vmatpush.bf16.msra.mxu1 %v1039_v5  ;;  %v1404_v37 = vld [vmem:[#allocation2 + $0x1f4] sm:$0xf]  ;;  %v1208_v38 = vld [vmem:[#allocation2 + $0x1f8] sm:$0xf0]  ;;  %v1354_v44 = vld [vmem:[#allocation2 + $0x64] sm:$0xf]  ;;  %v1147_v46 = vor.u32 %v1388_v33, %v1144_v34  ;;  %v1559_v55 = vpack.c.bf16 %v49_v42, %v49_v42 }
  0x25   :  { %474 = vmatpush.bf16.msra.mxu2 %v1103_v6  ;;  %v51_v39 = vld [vmem:[%s1775_s0 + $0x10] sm:$0xff]  ;;  %v52_v43 = vld [vmem:[%s1775_s0 + $0x18] sm:$0xff]  ;;  %v1008_v47 = vld [vmem:[#allocation2 + $0x68] sm:$0xf0]  ;;  %v1211_v50 = vor.u32 %v1404_v37, %v1208_v38 }
  0x26   :  { %487 = vmatpush.bf16.msra.mxu3 %v1167_v10  ;;  %v1370_v48 = vld [vmem:[#allocation2 + $0xe4] sm:$0xf]  ;;  %v50_v49 = vld [vmem:[%s1775_s0 + $0x8] sm:$0xff]  ;;  %v1557_v51 = vpack.c.bf16 %v51_v39, %v51_v39  ;;  %v1561_v56 = vpack.c.bf16 %v52_v43, %v52_v43  ;;  %v1011_v59 = vor.u32 %v1354_v44, %v1008_v47  ;;  %v1352_v63 = vld [vmem:[#allocation2 + $0x54] sm:$0xf] }
  0x27   :  { %449 = vmatpush.bf16.msra.mxu0 %v967_v16  ;;  %v1072_v52 = vld [vmem:[#allocation2 + $0xe8] sm:$0xf0]  ;;  %v1386_v53 = vld [vmem:[#allocation2 + $0x164] sm:$0xf]  ;;  %v1563_v60 = vpack.c.bf16 %v50_v49, %v50_v49  ;;  %v1000_v0 = vld [vmem:[#allocation2 + $0x58] sm:$0xf0] }
  0x28   :  { %462 = vmatpush.bf16.msra.mxu1 %v1031_v19  ;;  %v1136_v54 = vld [vmem:[#allocation2 + $0x168] sm:$0xf0]  ;;  %v1402_v57 = vld [vmem:[#allocation2 + $0x1e4] sm:$0xf]  ;;  %v1075_v61 = vor.u32 %v1370_v48, %v1072_v52  ;;  %v1368_v1 = vld [vmem:[#allocation2 + $0xd4] sm:$0xf]  ;;  %v1003_v8 = vor.u32 %v1352_v63, %v1000_v0 }
  0x29   :  { %475 = vmatpush.bf16.msra.mxu2 %v1095_v20  ;;  %v1200_v58 = vld [vmem:[#allocation2 + $0x1e8] sm:$0xf0]  ;;  %v1139_v62 = vor.u32 %v1386_v53, %v1136_v54  ;;  %v1064_v3 = vld [vmem:[#allocation2 + $0xd8] sm:$0xf0]  ;;  %v1384_v4 = vld [vmem:[#allocation2 + $0x154] sm:$0xf] }
  0x2a   :  { %488 = vmatpush.bf16.msra.mxu3 %v1159_v24  ;;  %v1203_v2 = vor.u32 %v1402_v57, %v1200_v58  ;;  %v1128_v5 = vld [vmem:[#allocation2 + $0x158] sm:$0xf0]  ;;  %v1400_v6 = vld [vmem:[#allocation2 + $0x1d4] sm:$0xf]  ;;  %v1067_v9 = vor.u32 %v1368_v1, %v1064_v3  ;;  %v1350_v11 = vld [vmem:[#allocation2 + $0x44] sm:$0xf] }
  0x2b   :  { %450 = vmatpush.bf16.msra.mxu0 %v959_v31  ;;  %v1192_v7 = vld [vmem:[#allocation2 + $0x1d8] sm:$0xf0]  ;;  %v1131_v10 = vor.u32 %v1384_v4, %v1128_v5  ;;  %v992_v12 = vld [vmem:[#allocation2 + $0x48] sm:$0xf0]  ;;  %v1366_v13 = vld [vmem:[#allocation2 + $0xc4] sm:$0xf] }
  0x2c   :  { %463 = vmatpush.bf16.msra.mxu1 %v1023_v35  ;;  %v1195_v14 = vor.u32 %v1400_v6, %v1192_v7  ;;  %v1056_v15 = vld [vmem:[#allocation2 + $0xc8] sm:$0xf0]  ;;  %v1382_v16 = vld [vmem:[#allocation2 + $0x144] sm:$0xf]  ;;  %v995_v20 = vor.u32 %v1350_v11, %v992_v12  ;;  %v1348_v23 = vld [vmem:[#allocation2 + $0x34] sm:$0xf] }
  0x2d   :  { %476 = vmatpush.bf16.msra.mxu2 %v1087_v36  ;;  %v1120_v17 = vld [vmem:[#allocation2 + $0x148] sm:$0xf0]  ;;  %v1398_v18 = vld [vmem:[#allocation2 + $0x1c4] sm:$0xf]  ;;  %v1059_v21 = vor.u32 %v1366_v13, %v1056_v15  ;;  %v984_v24 = vld [vmem:[#allocation2 + $0x38] sm:$0xf0] }
  0x2e   :  { %489 = vmatpush.bf16.msra.mxu3 %v1151_v40  ;;  %451 = vmatmul.bf16.vlgmr.msra.gmra.mxu0 %v1559_v55  ;;  %v1184_v19 = vld [vmem:[#allocation2 + $0x1c8] sm:$0xf0]  ;;  %v1123_v22 = vor.u32 %v1382_v16, %v1120_v17  ;;  %v1364_v25 = vld [vmem:[#allocation2 + $0xb4] sm:$0xf]  ;;  %v1048_v27 = vld [vmem:[#allocation2 + $0xb8] sm:$0xf0]  ;;  %v987_v32 = vor.u32 %v1348_v23, %v984_v24 }
  0x2f   :  { %495 = vmatpush.bf16.msrb.mxu0 %v1019_v41  ;;  %464 = vmatmul.bf16.vlgmr.msra.gmra.mxu1 %v1563_v60  ;;  %v1187_v26 = vor.u32 %v1398_v18, %v1184_v19  ;;  %v1380_v28 = vld [vmem:[#allocation2 + $0x134] sm:$0xf]  ;;  %v1112_v29 = vld [vmem:[#allocation2 + $0x138] sm:$0xf0]  ;;  %v1051_v33 = vor.u32 %v1364_v25, %v1048_v27  ;;  %v1346_v35 = vld [vmem:[#allocation2 + $0x24] sm:$0xf] }
  0x30   :  { %508 = vmatpush.bf16.msrb.mxu1 %v1083_v45  ;;  %477 = vmatmul.bf16.vlgmr.msra.gmra.mxu2 %v1557_v51  ;;  %v1396_v30 = vld [vmem:[#allocation2 + $0x1b4] sm:$0xf]  ;;  %v1176_v31 = vld [vmem:[#allocation2 + $0x1b8] sm:$0xf0]  ;;  %v1115_v34 = vor.u32 %v1380_v28, %v1112_v29  ;;  %v976_v36 = vld [vmem:[#allocation2 + $0x28] sm:$0xf0] }
  0x31   :  { %521 = vmatpush.bf16.msrb.mxu2 %v1147_v46  ;;  %490 = vmatmul.bf16.vlgmr.msra.gmra.mxu3 %v1561_v56  ;;  %v1362_v37 = vld [vmem:[#allocation2 + $0xa4] sm:$0xf]  ;;  %v1179_v38 = vor.u32 %v1396_v30, %v1176_v31  ;;  %v1040_v39 = vld [vmem:[#allocation2 + $0xa8] sm:$0xf0]  ;;  %v979_v44 = vor.u32 %v1346_v35, %v976_v36  ;;  %v1344_v47 = vld [vmem:[#allocation2 + $0x14] sm:$0xf] }
  0x32   :  { %534 = vmatpush.bf16.msrb.mxu3 %v1211_v50  ;;  %v1378_v40 = vld [vmem:[#allocation2 + $0x124] sm:$0xf]  ;;  %v1104_v41 = vld [vmem:[#allocation2 + $0x128] sm:$0xf0]  ;;  %v1043_v45 = vor.u32 %v1362_v37, %v1040_v39  ;;  %v968_v48 = vld [vmem:[#allocation2 + $0x18] sm:$0xf0] }
  0x33   :  { %496 = vmatpush.bf16.msrb.mxu0 %v1011_v59  ;;  %v1394_v42 = vld [vmem:[#allocation2 + $0x1a4] sm:$0xf]  ;;  %v1168_v43 = vld [vmem:[#allocation2 + $0x1a8] sm:$0xf0]  ;;  %v1107_v46 = vor.u32 %v1378_v40, %v1104_v41  ;;  %v1360_v49 = vld [vmem:[#allocation2 + $0x94] sm:$0xf]  ;;  %v971_v59 = vor.u32 %v1344_v47, %v968_v48 }
  0x34   :  { %509 = vmatpush.bf16.msrb.mxu1 %v1075_v61  ;;  %v1171_v50 = vor.u32 %v1394_v42, %v1168_v43  ;;  %v1032_v52 = vld [vmem:[#allocation2 + $0x98] sm:$0xf0]  ;;  %v1376_v53 = vld [vmem:[#allocation2 + $0x114] sm:$0xf]  ;;  %v1342_v61 = vld [vmem:[#allocation2 + $0x4] sm:$0xf] }
  0x35   :  { %522 = vmatpush.bf16.msrb.mxu2 %v1139_v62  ;;  %v1096_v54 = vld [vmem:[#allocation2 + $0x118] sm:$0xf0]  ;;  %v1392_v57 = vld [vmem:[#allocation2 + $0x194] sm:$0xf]  ;;  %v1035_v62 = vor.u32 %v1360_v49, %v1032_v52  ;;  %v960_v0 = vld [vmem:[#allocation2 + $0x8] sm:$0xf0] }
  0x36   :  { %535 = vmatpush.bf16.msrb.mxu3 %v1203_v2  ;;  %v1160_v58 = vld [vmem:[#allocation2 + $0x198] sm:$0xf0]  ;;  %v1099_v63 = vor.u32 %v1376_v53, %v1096_v54  ;;  %v1358_v1 = vld [vmem:[#allocation2 + $0x84] sm:$0xf]  ;;  %v1024_v2 = vld [vmem:[#allocation2 + $0x88] sm:$0xf0] }
  0x37   :  { %497 = vmatpush.bf16.msrb.mxu0 %v1003_v8  ;;  %v1163_v3 = vor.u32 %v1392_v57, %v1160_v58  ;;  %v1374_v4 = vld [vmem:[#allocation2 + $0x104] sm:$0xf]  ;;  %v1088_v5 = vld [vmem:[#allocation2 + $0x108] sm:$0xf0]  ;;  %v1308_v8 = vld [vmem:[%s1777_s2 + $0x70] sm:$0xf]  ;;  %v1027_v11 = vor.u32 %v1358_v1, %v1024_v2 }
  0x38   :  { %510 = vmatpush.bf16.msrb.mxu1 %v1067_v9  ;;  %v1390_v6 = vld [vmem:[#allocation2 + $0x184] sm:$0xf]  ;;  %v1152_v7 = vld [vmem:[#allocation2 + $0x188] sm:$0xf0]  ;;  %v1413_v9 = vld [vmem:[%s1777_s2 + $0x74] sm:$0xf0]  ;;  %v1091_v12 = vor.u32 %v1374_v4, %v1088_v5 }
  0x39   :  { %523 = vmatpush.bf16.msrb.mxu2 %v1131_v10  ;;  %v963_v10 = vor.u32 %v1342_v61, %v960_v0  ;;  %v1155_v13 = vor.u32 %v1390_v6, %v1152_v7  ;;  %v1304_v15 = vld [vmem:[%s1777_s2 + $0x60] sm:$0xf]  ;;  %v1412_v16 = vld [vmem:[%s1777_s2 + $0x64] sm:$0xf0]  ;;  %v1300_v18 = vld [vmem:[%s1777_s2 + $0x50] sm:$0xf] }
  0x3a   :  { %536 = vmatpush.bf16.msrb.mxu3 %v1195_v14  ;;  %v1309_v14 = vor.u32 %v1413_v9, %v1308_v8  ;;  %v1305_v17 = vor.u32 %v1412_v16, %v1304_v15  ;;  %v1411_v19 = vld [vmem:[%s1777_s2 + $0x54] sm:$0xf0]  ;;  %v1288_v23 = vld [vmem:[%s1777_s2 + $0x20] sm:$0xf]  ;;  %v1408_v24 = vld [vmem:[%s1777_s2 + $0x24] sm:$0xf0] }
  0x3b   :  { %498 = vmatpush.bf16.msrb.mxu0 %v995_v20  ;;  %v1301_v20 = vor.u32 %v1411_v19, %v1300_v18  ;;  %v1289_v25 = vor.u32 %v1408_v24, %v1288_v23  ;;  %v1407_v27 = vld [vmem:[%s1777_s2 + $0x14] sm:$0xf0]  ;;  %v1340_v28 = vld [vmem:[%s1777_s2 + $0xf0] sm:$0xf]  ;;  %v1336_v35 = vld [vmem:[%s1777_s2 + $0xe0] sm:$0xf] }
  0x3c   :  { %511 = vmatpush.bf16.msrb.mxu1 %v1059_v21  ;;  %v1410_v21 = vld [vmem:[%s1777_s2 + $0x44] sm:$0xf0]  ;;  %v1421_v30 = vld [vmem:[%s1777_s2 + $0xf4] sm:$0xf0]  ;;  %v1244_v41 = vld [vmem:[%s1777_s2 + $0x74] sm:$0xf] }
  0x3d   :  { %524 = vmatpush.bf16.msrb.mxu2 %v1123_v22  ;;  %v1341_v31 = vor.u32 %v1421_v30, %v1340_v28  ;;  %v1420_v36 = vld [vmem:[%s1777_s2 + $0xe4] sm:$0xf0]  ;;  %v1419_v39 = vld [vmem:[%s1777_s2 + $0xd4] sm:$0xf0]  ;;  %v1429_v42 = vld [vmem:[%s1777_s2 + $0x78] sm:$0xf0] }
  0x3e   :  { %537 = vmatpush.bf16.msrb.mxu3 %v1187_v26  ;;  %v1284_v26 = vld [vmem:[%s1777_s2 + $0x10] sm:$0xf]  ;;  %v1337_v37 = vor.u32 %v1420_v36, %v1336_v35  ;;  %v1245_v43 = vor.u32 %v1429_v42, %v1244_v41  ;;  %v1240_v47 = vld [vmem:[%s1777_s2 + $0x64] sm:$0xf]  ;;  %v1428_v48 = vld [vmem:[%s1777_s2 + $0x68] sm:$0xf0] }
  0x3f   :  { %499 = vmatpush.bf16.msrb.mxu0 %v987_v32  ;;  %v1285_v29 = vor.u32 %v1407_v27, %v1284_v26  ;;  %v1280_v32 = vld [vmem:[%s1777_s2] sm:$0xf]  ;;  %v1241_v49 = vor.u32 %v1428_v48, %v1240_v47  ;;  %v1417_v52 = vld [vmem:[%s1777_s2 + $0xb4] sm:$0xf0]  ;;  %v1236_v57 = vld [vmem:[%s1777_s2 + $0x54] sm:$0xf] }
  0x40   :  { %512 = vmatpush.bf16.msrb.mxu1 %v1051_v33  ;;  %v1406_v33 = vld [vmem:[%s1777_s2 + $0x4] sm:$0xf0]  ;;  %v121_v54 = vld [vmem:[#allocation4] sm:$0xff]  ;;  %v1427_v58 = vld [vmem:[%s1777_s2 + $0x58] sm:$0xf0] }
  0x41   :  { %525 = vmatpush.bf16.msrb.mxu2 %v1115_v34  ;;  %v1281_v34 = vor.u32 %v1406_v33, %v1280_v32  ;;  %v1320_v61 = vld [vmem:[%s1777_s2 + $0xa0] sm:$0xf]  ;;  %v1426_v4 = vld [vmem:[%s1777_s2 + $0x48] sm:$0xf0]  ;;  %v1316_v7 = vld [vmem:[%s1777_s2 + $0x90] sm:$0xf] }
  0x42   :  { %538 = vmatpush.bf16.msrb.mxu3 %v1179_v38  ;;  %v1332_v38 = vld [vmem:[%s1777_s2 + $0xd0] sm:$0xf]  ;;  %v1415_v8 = vld [vmem:[%s1777_s2 + $0x94] sm:$0xf0]  ;;  %v1312_v16 = vld [vmem:[%s1777_s2 + $0x80] sm:$0xf] }
  0x43   :  { %500 = vmatpush.bf16.msrb.mxu0 %v979_v44  ;;  %v1333_v40 = vor.u32 %v1419_v39, %v1332_v38  ;;  %v1328_v44 = vld [vmem:[%s1777_s2 + $0xc0] sm:$0xf]  ;;  %v1317_v9 = vor.u32 %v1415_v8, %v1316_v7  ;;  %v1424_v23 = vld [vmem:[%s1777_s2 + $0x28] sm:$0xf0]  ;;  %v1220_v33 = vld [vmem:[%s1777_s2 + $0x14] sm:$0xf] }
  0x44   :  { %513 = vmatpush.bf16.msrb.mxu1 %v1043_v45  ;;  %v1418_v45 = vld [vmem:[%s1777_s2 + $0xc4] sm:$0xf0]  ;;  %v1216_v39 = vld [vmem:[%s1777_s2 + $0x4] sm:$0xf]  ;;  %v1276_v42 = vld [vmem:[%s1777_s2 + $0xf4] sm:$0xf] }
  0x45   :  { %526 = vmatpush.bf16.msrb.mxu2 %v1107_v46  ;;  %v1329_v46 = vor.u32 %v1418_v45, %v1328_v44  ;;  %v1272_v47 = vld [vmem:[%s1777_s2 + $0xe4] sm:$0xf]  ;;  %v1436_v48 = vld [vmem:[%s1777_s2 + $0xe8] sm:$0xf0] }
  0x46   :  { %539 = vmatpush.bf16.msrb.mxu3 %v1171_v50  ;;  %v1324_v50 = vld [vmem:[%s1777_s2 + $0xb0] sm:$0xf] }
  0x47   :  { %501 = vmatpush.bf16.msrb.mxu0 %v971_v59  ;;  %v1325_v53 = vor.u32 %v1417_v52, %v1324_v50  ;;  %v1237_v59 = vor.u32 %v1427_v58, %v1236_v57  ;;  %v553_v50 = vld [vmem:[#allocation4 + $0x20] sm:$0xff]  ;;  %v557_v52 = vld [vmem:[#allocation4 + $0x30] sm:$0xff]  ;;  %v1435_v57 = vld [vmem:[%s1777_s2 + $0xd8] sm:$0xf0] }
  0x48   :  { %514 = vmatpush.bf16.msrb.mxu1 %v1035_v62  ;;  %v1416_v62 = vld [vmem:[%s1777_s2 + $0xa4] sm:$0xf0] }
  0x49   :  { %527 = vmatpush.bf16.msrb.mxu2 %v1099_v63  ;;  %v1321_v0 = vor.u32 %v1416_v62, %v1320_v61 }
  0x4a   :  { %540 = vmatpush.bf16.msrb.mxu3 %v1163_v3  ;;  %v1232_v3 = vld [vmem:[%s1777_s2 + $0x44] sm:$0xf] }
  0x4b   :  { %502 = vmatpush.bf16.msrb.mxu0 %v963_v10  ;;  %v1233_v6 = vor.u32 %v1426_v4, %v1232_v3  ;;  %v1264_v4 = vld [vmem:[%s1777_s2 + $0xc4] sm:$0xf] }
  0x4c   :  { %515 = vmatpush.bf16.msrb.mxu1 %v1027_v11 }
  0x4d   :  { %528 = vmatpush.bf16.msrb.mxu2 %v1091_v12 }
  0x4e   :  { %541 = vmatpush.bf16.msrb.mxu3 %v1155_v13  ;;  %503 = vmatmul.bf16.vlgmr.msrb.gmra.mxu0 %v1559_v55  ;;  %v1296_v55 = vld [vmem:[%s1777_s2 + $0x40] sm:$0xf]  ;;  %v1228_v13 = vld [vmem:[%s1777_s2 + $0x34] sm:$0xf] }
  0x4f   :  { %516 = vmatmul.bf16.vlgmr.msrb.gmra.mxu1 %v1563_v60  ;;  %v1297_v22 = vor.u32 %v1410_v21, %v1296_v55  ;;  %v1292_v60 = vld [vmem:[%s1777_s2 + $0x30] sm:$0xf]  ;;  %799 = vmatpush.bf16.msra.mxu0 %v1245_v43  ;;  %v577_v55 = vld [vmem:[#allocation4 + $0x60] sm:$0xff]  ;;  %v1437_v43 = vld [vmem:[%s1777_s2 + $0xf8] sm:$0xf0] }
  0x50   :  { %529 = vmatmul.bf16.vlgmr.msrb.gmra.mxu2 %v1557_v51  ;;  %v1409_v51 = vld [vmem:[%s1777_s2 + $0x34] sm:$0xf0]  ;;  %v1277_v45 = vor.u32 %v1437_v43, %v1276_v42 }
  0x51   :  { %921 = vmatpush.bf16.msra.mxu2 %v1309_v14  ;;  %542 = vmatmul.bf16.vlgmr.msrb.gmra.mxu3 %v1561_v56  ;;  %v1293_v56 = vor.u32 %v1409_v51, %v1292_v60  ;;  %v1425_v14 = vld [vmem:[%s1777_s2 + $0x38] sm:$0xf0]  ;;  %v573_v60 = vld [vmem:[#allocation4 + $0x50] sm:$0xff] }
  0x52   :  { %934 = vmatpush.bf16.msra.mxu3 %v1341_v31  ;;  %v1229_v15 = vor.u32 %v1425_v14, %v1228_v13  ;;  %v583_v51 = vld [vmem:[#allocation4 + $0x70] sm:$0xff]  ;;  %812 = vmatpush.bf16.msra.mxu1 %v1277_v45  ;;  %v1256_v14 = vld [vmem:[%s1777_s2 + $0xa4] sm:$0xf] }
  0x53   :  { %800 = vmatpush.bf16.msra.mxu0 %v1241_v49  ;;  %v1273_v49 = vor.u32 %v1436_v48, %v1272_v47  ;;  %v590_v47 = vld [vmem:[#allocation4 + $0x98] sm:$0xff] }
  0x55   :  { %922 = vmatpush.bf16.msra.mxu2 %v1305_v17  ;;  %v1414_v17 = vld [vmem:[%s1777_s2 + $0x84] sm:$0xf0] }
  0x56   :  { %935 = vmatpush.bf16.msra.mxu3 %v1337_v37  ;;  %v589_v37 = vld [vmem:[#allocation4 + $0x90] sm:$0xff]  ;;  %813 = vmatpush.bf16.msra.mxu1 %v1273_v49 }
  0x57   :  { %801 = vmatpush.bf16.msra.mxu0 %v1237_v59 }
  0x59   :  { %923 = vmatpush.bf16.msra.mxu2 %v1301_v20  ;;  %v1313_v20 = vor.u32 %v1414_v17, %v1312_v16 }
  0x5a   :  { %936 = vmatpush.bf16.msra.mxu3 %v1333_v40  ;;  %v1422_v40 = vld [vmem:[%s1777_s2 + $0x8] sm:$0xf0] }
  0x5b   :  { %802 = vmatpush.bf16.msra.mxu0 %v1233_v6  ;;  %v1217_v41 = vor.u32 %v1422_v40, %v1216_v39 }
  0x5d   :  { %924 = vmatpush.bf16.msra.mxu2 %v1297_v22 }
  0x5e   :  { %937 = vmatpush.bf16.msra.mxu3 %v1329_v46 }
  0x5f   :  { %803 = vmatpush.bf16.msra.mxu0 %v1229_v15  ;;  %v1432_v15 = vld [vmem:[%s1777_s2 + $0xa8] sm:$0xf0] }
  0x61   :  { %925 = vmatpush.bf16.msra.mxu2 %v1293_v56  ;;  %v1224_v56 = vld [vmem:[%s1777_s2 + $0x24] sm:$0xf] }
  0x62   :  { %938 = vmatpush.bf16.msra.mxu3 %v1325_v53  ;;  %v122_v53 = vld [vmem:[#allocation4 + $0x8] sm:$0xff] }
  0x65   :  { %926 = vmatpush.bf16.msra.mxu2 %v1289_v25 }
  0x66   :  { %939 = vmatpush.bf16.msra.mxu3 %v1321_v0 }
  0x69   :  { %927 = vmatpush.bf16.msra.mxu2 %v1285_v29  ;;  %v1225_v29 = vor.u32 %v1424_v23, %v1224_v56  ;;  %v1431_v56 = vld [vmem:[%s1777_s2 + $0x98] sm:$0xf0] }
  0x6a   :  { %940 = vmatpush.bf16.msra.mxu3 %v1317_v9 }
  0x6b   :  { %804 = vmatpush.bf16.msra.mxu0 %v1225_v29 }
  0x6d   :  { %928 = vmatpush.bf16.msra.mxu2 %v1281_v34  ;;  %v1423_v34 = vld [vmem:[%s1777_s2 + $0x18] sm:$0xf0] }
  0x6e   :  { %941 = vmatpush.bf16.msra.mxu3 %v1313_v20  ;;  %v1221_v35 = vor.u32 %v1423_v34, %v1220_v33 }
  0x70   :  { %805 = vmatpush.bf16.msra.mxu0 %v1221_v35 }
  0x74   :  { %806 = vmatpush.bf16.msra.mxu0 %v1217_v41 }
  0xab   :  { %v452_v63 = vpop.f32.mrf.mxu0 }
  0xac   :  { %v453_v1 = vadd.f32 %v452_v63, %v121_v54  ;;  %v465_v2 = vpop.f32.mrf.mxu1  ;;  %v1268_v54 = vld [vmem:[%s1777_s2 + $0xd4] sm:$0xf]  ;;  %v563_v63 = vld [vmem:[#allocation4 + $0x40] sm:$0xff] }
  0xad   :  { %v1269_v62 = vor.u32 %v1435_v57, %v1268_v54 }
  0xae   :  { %v466_v5 = vadd.f32 %v465_v2, %v453_v1 }
  0xaf   :  { %814 = vmatpush.bf16.msra.mxu1 %v1269_v62  ;;  %v558_v62 = vld [vmem:[#allocation4 + $0x38] sm:$0xff] }
  0xb3   :  { %v478_v10 = vpop.f32.mrf.mxu2  ;;  %v454_v19 = vpop.f32.mrf.mxu0 }
  0xb4   :  { %v479_v11 = vadd.f32 %v478_v10, %v466_v5  ;;  %v491_v12 = vpop.f32.mrf.mxu3  ;;  %v467_v21 = vpop.f32.mrf.mxu1  ;;  %v1434_v5 = vld [vmem:[%s1777_s2 + $0xc8] sm:$0xf0]  ;;  %v1260_v10 = vld [vmem:[%s1777_s2 + $0xb4] sm:$0xf] }
  0xb5   :  { %v1265_v9 = vor.u32 %v1434_v5, %v1264_v4 }
  0xb6   :  { %v492_v18 = vadd.f32 %v491_v12, %v479_v11  ;;  %v1433_v11 = vld [vmem:[%s1777_s2 + $0xb8] sm:$0xf0] }
  0xb7   :  { %815 = vmatpush.bf16.msra.mxu1 %v1265_v9  ;;  %v1261_v12 = vor.u32 %v1433_v11, %v1260_v10 }
  0xb8   :  { %v547_v22 = vmax.f32 %v492_v18, 0.0 }
  0xba   :  { %v549_v24 = vrot.slane %v547_v22, 7  ;;  %v551_v25 = vrot.slane %v547_v22, 1  ;;  %v579_v26 = vmul.f32 %v577_v55, %v547_v22  ;;  %v635_v28 = vpack.c.bf16 %v547_v22, %v547_v22  ;;  %v569_v55 = vld [vmem:[#allocation4 + $0x80] sm:$0xff] }
  0xbb   :  { %v480_v27 = vpop.f32.mrf.mxu2  ;;  %v559_v59 = vmul.f32 %v557_v52, %v547_v22  ;;  %816 = vmatpush.bf16.msra.mxu1 %v1261_v12  ;;  %v1257_v22 = vor.u32 %v1432_v15, %v1256_v14 }
  0xbc   :  { %v575_v30 = vmul.f32 %v573_v60, %v549_v24  ;;  %v585_v31 = vmul.f32 %v583_v51, %v551_v25  ;;  %v493_v32 = vpop.f32.mrf.mxu3  ;;  %929 = vmatmul.bf16.vlgmr.msra.gmra.mxu2 %v635_v28  ;;  %v555_v58 = vmul.f32 %v553_v50, %v549_v24  ;;  %v565_v7 = vmul.f32 %v563_v63, %v551_v25  ;;  %v1252_v51 = vld [vmem:[%s1777_s2 + $0x94] sm:$0xf]  ;;  %v578_v27 = vld [vmem:[#allocation4 + $0x68] sm:$0xff] }
  0xbd   :  { %v584_v32 = vld [vmem:[#allocation4 + $0x78] sm:$0xff] }
  0xbe   :  { %v581_v36 = vadd.f32 %v579_v26, %v575_v30  ;;  %v561_v6 = vadd.f32 %v559_v59, %v555_v58  ;;  %v574_v26 = vld [vmem:[#allocation4 + $0x58] sm:$0xff] }
  0xbf   :  { %817 = vmatpush.bf16.msra.mxu1 %v1257_v22 }
  0xc0   :  { %v587_v38 = vadd.f32 %v585_v31, %v581_v36  ;;  %v567_v19 = vadd.f32 %v565_v7, %v561_v6  ;;  %v1253_v31 = vor.u32 %v1431_v56, %v1252_v51  ;;  %v1248_v36 = vld [vmem:[%s1777_s2 + $0x84] sm:$0xf]  ;;  %v570_v7 = vld [vmem:[#allocation4 + $0x88] sm:$0xff] }
  0xc2   :  { %v591_v44 = vadd.f32 %v589_v37, %v587_v38  ;;  %v571_v24 = vadd.f32 %v569_v55, %v567_v19  ;;  %v1430_v37 = vld [vmem:[%s1777_s2 + $0x88] sm:$0xf0] }
  0xc3   :  { %818 = vmatpush.bf16.msra.mxu1 %v1253_v31 }
  0xc4   :  { %v1212_v46 = vmul.f32 -1.442695, %v591_v44 }
  0xc6   :  { %1444 = vpow2.f32 %v1212_v46  ;;  %v1249_v46 = vor.u32 %v1430_v37, %v1248_v36 }
  0xc8   :  { %819 = vmatpush.bf16.msra.mxu1 %v1249_v46 }
  0xcb   :  { %v504_v61 = vpop.f32.mrf.mxu0 }
  0xcc   :  { %v505_v0 = vadd.f32 %v504_v61, %v122_v53  ;;  %v517_v1 = vpop.f32.mrf.mxu1  ;;  %v1445_v2 = vpop.eup %1444  ;;  %v554_v61 = vld [vmem:[#allocation4 + $0x28] sm:$0xff] }
  0xcd   :  { %v1735_v3 = vadd.f32 1.0, %v1445_v2  ;;  %v564_v2 = vld [vmem:[#allocation4 + $0x48] sm:$0xff] }
  0xce   :  { %v518_v8 = vadd.f32 %v517_v1, %v505_v0 }
  0xcf   :  { %1446 = vrcp.f32 %v1735_v3  ;;  %v614_v30 = vand.u32 2147483648, %v1735_v3  ;;  %vm608_vm0 = vweird.f32 %v1735_v3  ;;  %v612_v42 = vand.u32 2147483647, %v1735_v3 }
  0xd0   :  { %1448 = vtanh.f32 %v571_v24 }
  0xd1   :  { %v615_v45 = vor.u32 1.1754944e-38, %v614_v30  ;;  %vm613_vm3 = vcmp.eq.f32.partialorder %v612_v42, 8.507059e+37 }
  0xd3   :  { %v530_v13 = vpop.f32.mrf.mxu2  ;;  %v506_v18 = vpop.f32.mrf.mxu0 }
  0xd4   :  { %v531_v16 = vadd.f32 %v530_v13, %v518_v8  ;;  %v543_v17 = vpop.f32.mrf.mxu3  ;;  %v519_v20 = vpop.f32.mrf.mxu1 }
  0xd5   :  { %v1447_v60 = vpop.eup %1446 }
  0xd6   :  { %v544_v21 = vadd.f32 %v543_v17, %v531_v16  ;;  %v604_v25 = vmul.f32 %v1447_v60, %v1735_v3  ;;  %vm609_vm1 = vweird.f32 %v1447_v60  ;;  %v1449_v52 = vpop.eup %1448 }
  0xd7   :  { %vm610_vm2 = vmor %vm608_vm0, %vm609_vm1 }
  0xd8   :  { %v548_v23 = vmax.f32 %v544_v21, 0.0  ;;  %v605_v35 = vsub.f32 1.0, %v604_v25 }
  0xda   :  { %v550_v28 = vrot.slane %v548_v23, 7  ;;  %v552_v29 = vrot.slane %v548_v23, 1  ;;  %v636_v34 = vpack.c.bf16 %v548_v23, %v548_v23  ;;  %v580_v39 = vmul.f32 %v578_v27, %v548_v23  ;;  %v947_v27 = vld [vmem:[#allocation4 + $0x10] sm:$0xff] }
  0xdb   :  { %v532_v33 = vpop.f32.mrf.mxu2  ;;  %v606_v41 = vmul.f32 %v1447_v60, %v605_v35  ;;  %v560_v0 = vmul.f32 %v558_v62, %v548_v23 }
  0xdc   :  { %v576_v38 = vmul.f32 %v574_v26, %v550_v28  ;;  %v545_v40 = vpop.f32.mrf.mxu3  ;;  %942 = vmatmul.bf16.vlgmr.msra.gmra.mxu3 %v636_v34  ;;  %v586_v44 = vmul.f32 %v584_v32, %v552_v29  ;;  %v556_v63 = vmul.f32 %v554_v61, %v550_v28  ;;  %v566_v5 = vmul.f32 %v564_v2, %v552_v29 }
  0xdd   :  { %v607_v48 = vadd.f32 %v1447_v60, %v606_v41 }
  0xde   :  { %v582_v43 = vadd.f32 %v580_v39, %v576_v38  ;;  %v562_v3 = vadd.f32 %v560_v0, %v556_v63 }
  0xdf   :  { %v611_v50 = vsel %vm610_vm2, %v1447_v60, %v607_v48 }
  0xe0   :  { %v588_v49 = vadd.f32 %v586_v44, %v582_v43  ;;  %v616_v54 = vsel %vm613_vm3, %v615_v45, %v611_v50  ;;  %v568_v6 = vadd.f32 %v566_v5, %v562_v3 }
  0xe1   :  { %v633_v57 = vmul.f32 %v1449_v52, %v616_v54 }
  0xe2   :  { %v592_v53 = vadd.f32 %v590_v47, %v588_v49  ;;  %v572_v9 = vadd.f32 %v570_v7, %v568_v6 }
  0xe3   :  { %v669_v59 = vpack.c.bf16 %v633_v57, %v633_v57 }
  0xe4   :  { %v1213_v58 = vmul.f32 -1.442695, %v592_v53 }
  0xe5   :  { %807 = vmatmul.bf16.vlgmr.msra.gmra.mxu0 %v669_v59 }
  0xe6   :  { %1450 = vpow2.f32 %v1213_v58 }
  0xec   :  { %v1451_v1 = vpop.eup %1450 }
  0xed   :  { %v602_v4 = vadd.f32 1.0, %v1451_v1 }
  0xef   :  { %1452 = vrcp.f32 %v602_v4  ;;  %v629_v12 = vand.u32 2147483648, %v602_v4  ;;  %v627_v14 = vand.u32 2147483647, %v602_v4  ;;  %vm623_vm5 = vweird.f32 %v602_v4 }
  0xf0   :  { %1454 = vtanh.f32 %v572_v9 }
  0xf1   :  { %v630_v16 = vor.u32 1.1754944e-38, %v629_v12  ;;  %vm628_vm7 = vcmp.eq.f32.partialorder %v627_v14, 8.507059e+37 }
  0xf5   :  { %v1453_v8 = vpop.eup %1452 }
  0xf6   :  { %v619_v10 = vmul.f32 %v1453_v8, %v602_v4  ;;  %vm624_vm4 = vweird.f32 %v1453_v8  ;;  %v1455_v18 = vpop.eup %1454 }
  0xf7   :  { %vm625_vm6 = vmor %vm623_vm5, %vm624_vm4 }
  0xf8   :  { %v620_v11 = vsub.f32 1.0, %v619_v10 }
  0xfa   :  { %v621_v13 = vmul.f32 %v1453_v8, %v620_v11 }
  0xfc   :  { %v622_v15 = vadd.f32 %v1453_v8, %v621_v13 }
  0xfe   :  { %v626_v17 = vsel %vm625_vm6, %v1453_v8, %v622_v15 }
  0xff   :  { %v631_v19 = vsel %vm628_vm7, %v630_v16, %v626_v17 }
 0x100   :  { %v634_v20 = vmul.f32 %v1455_v18, %v631_v19 }
 0x102   :  { %v670_v55 = vpack.c.bf16 %v634_v20, %v634_v20 }
 0x104   :  { %820 = vmatmul.bf16.vlgmr.msra.gmra.mxu1 %v670_v55 }
 0x13f   :  { %v930_v21 = vpop.f32.mrf.mxu2 }
 0x147   :  { %v932_v22 = vpop.f32.mrf.mxu2 }
 0x15f   :  { %v943_v60 = vpop.f32.mrf.mxu3 }
 0x162   :  { %v808_v51 = vpop.f32.mrf.mxu0 }
 0x167   :  { %v945_v56 = vpop.f32.mrf.mxu3 }
 0x16a   :  { %v810_v23 = vpop.f32.mrf.mxu0 }
 0x181   :  { %v821_v24 = vpop.f32.mrf.mxu1 }
 0x182   :  { %v822_v25 = vadd.f32 %v821_v24, %v808_v51 }
 0x184   :  { %v931_v26 = vadd.f32 %v930_v21, %v822_v25 }
 0x186   :  { %v944_v28 = vadd.f32 %v943_v60, %v931_v26 }
 0x188   :  { %v948_v29 = vadd.f32 %v947_v27, %v944_v28 }
 0x189   :  { %v823_v30 = vpop.f32.mrf.mxu1 }
 0x18a   :  { %949 = vst [vmem:[%s1779_s4] sm:$0xff] %v948_v29 }
 0x18b   :  { %954 = vsyncpa [#allocation3], 1 }
 0x18c   :  { %955 = vsyncpa [#allocation5], 1 }

</bundles_post_ra>
